<compile_context>
chip_gen: v6e
topology: v6e:2x2x1
jax: 0.10.0
libtpu: 0.0.40
codegen_flags: <defaults>
</compile_context>

<pallas_src>
import functools

import jax
import jax.numpy as jnp
from jax.experimental import pallas as pl
from jax.experimental.pallas import tpu as pltpu

_EPS = 1e-5  # InstanceNorm2d default eps, affine=False, biased variance


def _dsconv_fused_kernel(x_ref, dw9_ref, pwbd_ref, o_ref, *, H, W):
    """Fused _DSConv forward for one block of NB batch elements.

    x_ref:    (NB*C, H*W)        input, batch folded into the sublane axis
    dw9_ref:  (9, NB*C, 1)       depthwise 3x3 taps, tap-major, tiled over NB
    pwbd_ref: (NB*O, NB*C)       block-diagonal pointwise 1x1 weight
    o_ref:    (NB*O, H*W)        output
    """
    HW = H * W
    x = x_ref[...].astype(jnp.float32)                       # (R, HW)

    # ---- boundary masks, built in-kernel (one (1, HW) iota, computed once).
    idx = jax.lax.broadcasted_iota(jnp.int32, (1, HW), 1)
    if W & (W - 1) == 0:                                      # static Python branch
        w_idx = jnp.bitwise_and(idx, W - 1)
    else:
        w_idx = jnp.remainder(idx, W)
    wmask_l = jnp.where(w_idx >= 1, 1.0, 0.0)                 # w-1 >= 0 valid
    wmask_r = jnp.where(w_idx < W - 1, 1.0, 0.0)              # w+1 <  W valid
    hmask_t = jnp.where(idx >= W, 1.0, 0.0)                   # h-1 >= 0 valid
    hmask_b = jnp.where(idx < HW - W, 1.0, 0.0)               # h+1 <  H valid

    # ---- depthwise 3x3 via lane rotations (XLU) + masked FMAs (VPU).
    # v_l[q] = x[q-1] (masked), v_r[q] = x[q+1] (masked); all shifts positive.
    v_c = x
    v_l = pltpu.roll(x, 1, 1) * wmask_l
    v_r = pltpu.roll(x, HW - 1, 1) * wmask_r

    # tap index t = (dh+1)*3 + (dw+1); each dw9_ref[t] is (R, 1).
    r_top = dw9_ref[0] * v_l + dw9_ref[1] * v_c + dw9_ref[2] * v_r   # dh = -1
    r_mid = dw9_ref[3] * v_l + dw9_ref[4] * v_c + dw9_ref[5] * v_r   # dh =  0
    r_bot = dw9_ref[6] * v_l + dw9_ref[7] * v_c + dw9_ref[8] * v_r   # dh = +1

    acc = (r_mid
           + hmask_t * pltpu.roll(r_top, W, 1)        # contribution from row h-1
           + hmask_b * pltpu.roll(r_bot, HW - W, 1))  # contribution from row h+1

    inv_hw = 1.0 / HW

    # ---- InstanceNorm (per row = per (n, c) channel) + ReLU.
    mean = jnp.sum(acc, axis=1, keepdims=True) * inv_hw
    var = jnp.maximum(jnp.sum(acc * acc, axis=1, keepdims=True) * inv_hw
                      - mean * mean, 0.0)
    y = jnp.maximum((acc - mean) * jax.lax.rsqrt(var + _EPS), 0.0)   # (R, HW)

    # ---- pointwise 1x1 conv: block-diagonal (NB*O, NB*C) @ (NB*C, HW) matmul.
    # TODO(synk): bf16 inputs + f32 accumulation at production C once tolerance allows.
    z = jnp.dot(pwbd_ref[...].astype(jnp.float32), y,
                preferred_element_type=jnp.float32)                  # (NB*O, HW)

    # ---- InstanceNorm + ReLU on output channels.
    mean2 = jnp.sum(z, axis=1, keepdims=True) * inv_hw
    var2 = jnp.maximum(jnp.sum(z * z, axis=1, keepdims=True) * inv_hw
                       - mean2 * mean2, 0.0)
    o_ref[...] = jnp.maximum((z - mean2) * jax.lax.rsqrt(var2 + _EPS),
                             0.0).astype(o_ref.dtype)


def _pick_batch_block(N, C, O, HW):
    """Largest divisor of N that keeps the per-step f32 working set small and
    the sublane axis a multiple of 8 (or the full batch)."""
    budget = 8 * 1024 * 1024
    cands = [nb for nb in range(1, N + 1)
             if N % nb == 0
             and (((nb * C) % 8 == 0 and (nb * O) % 8 == 0) or nb == N)]
    best = cands[0]
    for nb in cands:
        ws = 4 * HW * nb * (8 * C + 4 * O)   # rough: blocks + intermediates, f32
        if ws <= budget:
            best = nb
    return best


def dsconv_forward(x, dw_w, pw_w):
    """x: (N, C, H, W) f32; dw_w: (C, 3, 3); pw_w: (O, C). stride=1, padding=1."""
    N, C, H, W = x.shape
    O = pw_w.shape[0]
    HW = H * W

    NB = _pick_batch_block(N, C, O, HW)
    R_in, R_out = NB * C, NB * O

    # Free layout glue: batch folded into the row (sublane) axis.
    x2d = x.reshape(N * C, HW)

    # Tap-major depthwise weight, tiled across the NB batch elems packed per step:
    # dw9[t, nb*C + c, 0] = dw_w[c, t//3, t%3].
    dw9 = jnp.transpose(dw_w.reshape(C, 9), (1, 0)).reshape(9, C, 1)
    dw9 = jnp.tile(dw9, (1, NB, 1))                               # (9, NB*C, 1)

    # Block-diagonal pointwise weight: block (n, n) = pw_w, zeros elsewhere.
    eye = jnp.eye(NB, dtype=pw_w.dtype)
    pw_bd = jnp.einsum('mn,oc->monc', eye, pw_w).reshape(R_out, R_in)

    kern = functools.partial(_dsconv_fused_kernel, H=H, W=W)

    out = pl.pallas_call(
        kern,
        out_shape=jax.ShapeDtypeStruct((N * O, HW), jnp.float32),
        grid=(N // NB,),
        in_specs=[
            pl.BlockSpec((R_in, HW), lambda b: (b, 0)),
            pl.BlockSpec((9, R_in, 1), lambda b: (0, 0, 0)),
            pl.BlockSpec((R_out, R_in), lambda b: (0, 0)),
        ],
        out_specs=pl.BlockSpec((R_out, HW), lambda b: (b, 0)),
        compiler_params=pltpu.CompilerParams(
            # TODO(synk): pltpu.CORE_PARALLEL here on v7x when N // NB > 1.
            dimension_semantics=("parallel",),
            vmem_limit_bytes=32 * 1024 * 1024,
        ),
    )(x2d, dw9, pw_bd)

    return out.reshape(N, O, H, W)


def _ref_dsconv(x, dw_w, pw_w):
    """Pure-JAX reference (matches PyTorch _DSConv semantics)."""
    N, C, H, W = x.shape
    O = pw_w.shape[0]

    def inorm_relu(t):
        m = t.mean(axis=(2, 3), keepdims=True)
        v = ((t - m) ** 2).mean(axis=(2, 3), keepdims=True)
        return jnp.maximum((t - m) * jax.lax.rsqrt(v + _EPS), 0.0)

    y = jax.lax.conv_general_dilated(
        x, dw_w.reshape(C, 1, 3, 3), window_strides=(1, 1),
        padding=((1, 1), (1, 1)),
        dimension_numbers=("NCHW", "OIHW", "NCHW"), feature_group_count=C)
    y = inorm_relu(y)
    z = jax.lax.conv_general_dilated(
        y, pw_w.reshape(O, C, 1, 1), window_strides=(1, 1), padding="VALID",
        dimension_numbers=("NCHW", "OIHW", "NCHW"))
    return inorm_relu(z)


if __name__ == "__main__":
    N, C, O, H, W = 2, 4, 8, 16, 16
    key = jax.random.PRNGKey(0)
    kx, kdw, kpw = jax.random.split(key, 3)
    x = jax.random.normal(kx, (N, C, H, W), jnp.float32)
    dw_w = jax.random.normal(kdw, (C, 3, 3), jnp.float32) * 0.3   # depthwise 3x3
    pw_w = jax.random.normal(kpw, (O, C), jnp.float32) * 0.3      # pointwise 1x1

    out = jax.block_until_ready(dsconv_forward(x, dw_w, pw_w))
    ref = jax.block_until_ready(_ref_dsconv(x, dw_w, pw_w))

    assert out.shape == (N, O, H, W), out.shape
    max_err = float(jnp.max(jnp.abs(out - ref)))
    assert jnp.allclose(out, ref, atol=1e-3, rtol=1e-3), f"max_err={max_err}"
    print("KERNEL_OK")
</pallas_src>

<mosaic_0001>
module attributes {stable_mosaic.version = 11 : i64} {
  func.func @_dsconv_fused_kernel(%arg0: i32, %arg1: memref<8x256xf32, #tpu.memory_space<vmem>>, %arg2: memref<9x8x1xf32, #tpu.memory_space<vmem>>, %arg3: memref<16x8xf32, #tpu.memory_space<vmem>>, %arg4: memref<16x256xf32, #tpu.memory_space<vmem>>) attributes {dimension_semantics = [#tpu.dimension_semantics<parallel>], iteration_bounds = array<i64: 1>, scalar_prefetch = 0 : i64, scratch_operands = 0 : i64, tpu.core_type = #tpu.core_type<tc>, window_params = [{transform_indices = @transform_0, window_bounds = array<i64: 8, 256>}, {pipeline_mode = #tpu.pipeline_mode<synchronous>, transform_indices = @transform_1, window_bounds = array<i64: 9, 8, 1>}, {pipeline_mode = #tpu.pipeline_mode<synchronous>, transform_indices = @transform_2, window_bounds = array<i64: 16, 8>}, {transform_indices = @transform_3, window_bounds = array<i64: 16, 256>}]} {
    %c0 = arith.constant 0 : index
    %c0_0 = arith.constant 0 : index
    %0 = vector.load %arg1[%c0, %c0_0] : memref<8x256xf32, #tpu.memory_space<vmem>>, vector<8x256xf32>
    %1 = tpu.iota {dimensions = array<i32: 1>} : vector<1x256xi32>
    %c15_i32 = arith.constant 15 : i32
    %2 = vector.broadcast %c15_i32 : i32 to vector<1x256xi32>
    %3 = arith.andi %1, %2 : vector<1x256xi32>
    %c1_i32 = arith.constant 1 : i32
    %4 = vector.broadcast %c1_i32 : i32 to vector<1x256xi32>
    %5 = arith.cmpi sge, %3, %4 : vector<1x256xi32>
    %cst = arith.constant 1.000000e+00 : f32
    %cst_1 = arith.constant 0.000000e+00 : f32
    %6 = vector.broadcast %cst : f32 to vector<1x256xf32>
    %7 = vector.broadcast %cst_1 : f32 to vector<1x256xf32>
    %8 = arith.select %5, %6, %7 : vector<1x256xi1>, vector<1x256xf32>
    %c15_i32_2 = arith.constant 15 : i32
    %9 = vector.broadcast %c15_i32_2 : i32 to vector<1x256xi32>
    %10 = arith.cmpi slt, %3, %9 : vector<1x256xi32>
    %cst_3 = arith.constant 1.000000e+00 : f32
    %cst_4 = arith.constant 0.000000e+00 : f32
    %11 = vector.broadcast %cst_3 : f32 to vector<1x256xf32>
    %12 = vector.broadcast %cst_4 : f32 to vector<1x256xf32>
    %13 = arith.select %10, %11, %12 : vector<1x256xi1>, vector<1x256xf32>
    %c16_i32 = arith.constant 16 : i32
    %14 = vector.broadcast %c16_i32 : i32 to vector<1x256xi32>
    %15 = arith.cmpi sge, %1, %14 : vector<1x256xi32>
    %cst_5 = arith.constant 1.000000e+00 : f32
    %cst_6 = arith.constant 0.000000e+00 : f32
    %16 = vector.broadcast %cst_5 : f32 to vector<1x256xf32>
    %17 = vector.broadcast %cst_6 : f32 to vector<1x256xf32>
    %18 = arith.select %15, %16, %17 : vector<1x256xi1>, vector<1x256xf32>
    %c240_i32 = arith.constant 240 : i32
    %19 = vector.broadcast %c240_i32 : i32 to vector<1x256xi32>
    %20 = arith.cmpi slt, %1, %19 : vector<1x256xi32>
    %cst_7 = arith.constant 1.000000e+00 : f32
    %cst_8 = arith.constant 0.000000e+00 : f32
    %21 = vector.broadcast %cst_7 : f32 to vector<1x256xf32>
    %22 = vector.broadcast %cst_8 : f32 to vector<1x256xf32>
    %23 = arith.select %20, %21, %22 : vector<1x256xi1>, vector<1x256xf32>
    %c1_i32_9 = arith.constant 1 : i32
    %24 = tpu.dynamic_rotate %0 by %c1_i32_9 dim 1 : vector<8x256xf32>, i32 -> vector<8x256xf32>
    %25 = vector.broadcast %8 : vector<1x256xf32> to vector<8x256xf32>
    %26 = arith.mulf %24, %25 : vector<8x256xf32>
    %c255_i32 = arith.constant 255 : i32
    %27 = tpu.dynamic_rotate %0 by %c255_i32 dim 1 : vector<8x256xf32>, i32 -> vector<8x256xf32>
    %28 = vector.broadcast %13 : vector<1x256xf32> to vector<8x256xf32>
    %29 = arith.mulf %27, %28 : vector<8x256xf32>
    %c0_10 = arith.constant 0 : index
    %c0_11 = arith.constant 0 : index
    %c0_12 = arith.constant 0 : index
    %30 = vector.load %arg2[%c0_10, %c0_11, %c0_12] : memref<9x8x1xf32, #tpu.memory_space<vmem>>, vector<1x8x1xf32>
    %31 = vector.shape_cast %30 : vector<1x8x1xf32> to vector<8x1xf32>
    %32 = vector.broadcast %31 : vector<8x1xf32> to vector<8x256xf32>
    %33 = arith.mulf %32, %26 : vector<8x256xf32>
    %c1 = arith.constant 1 : index
    %c0_13 = arith.constant 0 : index
    %c0_14 = arith.constant 0 : index
    %34 = vector.load %arg2[%c1, %c0_13, %c0_14] : memref<9x8x1xf32, #tpu.memory_space<vmem>>, vector<1x8x1xf32>
    %35 = vector.shape_cast %34 : vector<1x8x1xf32> to vector<8x1xf32>
    %36 = vector.broadcast %35 : vector<8x1xf32> to vector<8x256xf32>
    %37 = arith.mulf %36, %0 : vector<8x256xf32>
    %38 = arith.addf %33, %37 : vector<8x256xf32>
    %c2 = arith.constant 2 : index
    %c0_15 = arith.constant 0 : index
    %c0_16 = arith.constant 0 : index
    %39 = vector.load %arg2[%c2, %c0_15, %c0_16] : memref<9x8x1xf32, #tpu.memory_space<vmem>>, vector<1x8x1xf32>
    %40 = vector.shape_cast %39 : vector<1x8x1xf32> to vector<8x1xf32>
    %41 = vector.broadcast %40 : vector<8x1xf32> to vector<8x256xf32>
    %42 = arith.mulf %41, %29 : vector<8x256xf32>
    %43 = arith.addf %38, %42 : vector<8x256xf32>
    %c3 = arith.constant 3 : index
    %c0_17 = arith.constant 0 : index
    %c0_18 = arith.constant 0 : index
    %44 = vector.load %arg2[%c3, %c0_17, %c0_18] : memref<9x8x1xf32, #tpu.memory_space<vmem>>, vector<1x8x1xf32>
    %45 = vector.shape_cast %44 : vector<1x8x1xf32> to vector<8x1xf32>
    %46 = vector.broadcast %45 : vector<8x1xf32> to vector<8x256xf32>
    %47 = arith.mulf %46, %26 : vector<8x256xf32>
    %c4 = arith.constant 4 : index
    %c0_19 = arith.constant 0 : index
    %c0_20 = arith.constant 0 : index
    %48 = vector.load %arg2[%c4, %c0_19, %c0_20] : memref<9x8x1xf32, #tpu.memory_space<vmem>>, vector<1x8x1xf32>
    %49 = vector.shape_cast %48 : vector<1x8x1xf32> to vector<8x1xf32>
    %50 = vector.broadcast %49 : vector<8x1xf32> to vector<8x256xf32>
    %51 = arith.mulf %50, %0 : vector<8x256xf32>
    %52 = arith.addf %47, %51 : vector<8x256xf32>
    %c5 = arith.constant 5 : index
    %c0_21 = arith.constant 0 : index
    %c0_22 = arith.constant 0 : index
    %53 = vector.load %arg2[%c5, %c0_21, %c0_22] : memref<9x8x1xf32, #tpu.memory_space<vmem>>, vector<1x8x1xf32>
    %54 = vector.shape_cast %53 : vector<1x8x1xf32> to vector<8x1xf32>
    %55 = vector.broadcast %54 : vector<8x1xf32> to vector<8x256xf32>
    %56 = arith.mulf %55, %29 : vector<8x256xf32>
    %57 = arith.addf %52, %56 : vector<8x256xf32>
    %c6 = arith.constant 6 : index
    %c0_23 = arith.constant 0 : index
    %c0_24 = arith.constant 0 : index
    %58 = vector.load %arg2[%c6, %c0_23, %c0_24] : memref<9x8x1xf32, #tpu.memory_space<vmem>>, vector<1x8x1xf32>
    %59 = vector.shape_cast %58 : vector<1x8x1xf32> to vector<8x1xf32>
    %60 = vector.broadcast %59 : vector<8x1xf32> to vector<8x256xf32>
    %61 = arith.mulf %60, %26 : vector<8x256xf32>
    %c7 = arith.constant 7 : index
    %c0_25 = arith.constant 0 : index
    %c0_26 = arith.constant 0 : index
    %62 = vector.load %arg2[%c7, %c0_25, %c0_26] : memref<9x8x1xf32, #tpu.memory_space<vmem>>, vector<1x8x1xf32>
    %63 = vector.shape_cast %62 : vector<1x8x1xf32> to vector<8x1xf32>
    %64 = vector.broadcast %63 : vector<8x1xf32> to vector<8x256xf32>
    %65 = arith.mulf %64, %0 : vector<8x256xf32>
    %66 = arith.addf %61, %65 : vector<8x256xf32>
    %c8 = arith.constant 8 : index
    %c0_27 = arith.constant 0 : index
    %c0_28 = arith.constant 0 : index
    %67 = vector.load %arg2[%c8, %c0_27, %c0_28] : memref<9x8x1xf32, #tpu.memory_space<vmem>>, vector<1x8x1xf32>
    %68 = vector.shape_cast %67 : vector<1x8x1xf32> to vector<8x1xf32>
    %69 = vector.broadcast %68 : vector<8x1xf32> to vector<8x256xf32>
    %70 = arith.mulf %69, %29 : vector<8x256xf32>
    %71 = arith.addf %66, %70 : vector<8x256xf32>
    %c16_i32_29 = arith.constant 16 : i32
    %72 = tpu.dynamic_rotate %43 by %c16_i32_29 dim 1 : vector<8x256xf32>, i32 -> vector<8x256xf32>
    %73 = vector.broadcast %18 : vector<1x256xf32> to vector<8x256xf32>
    %74 = arith.mulf %73, %72 : vector<8x256xf32>
    %75 = arith.addf %57, %74 : vector<8x256xf32>
    %c240_i32_30 = arith.constant 240 : i32
    %76 = tpu.dynamic_rotate %71 by %c240_i32_30 dim 1 : vector<8x256xf32>, i32 -> vector<8x256xf32>
    %77 = vector.broadcast %23 : vector<1x256xf32> to vector<8x256xf32>
    %78 = arith.mulf %77, %76 : vector<8x256xf32>
    %79 = arith.addf %75, %78 : vector<8x256xf32>
    %cst_31 = arith.constant dense<0.000000e+00> : vector<8xf32>
    %80 = vector.multi_reduction <add>, %79, %cst_31 [1] : vector<8x256xf32> to vector<8xf32>
    %81 = vector.shape_cast %80 : vector<8xf32> to vector<8x1xf32>
    %cst_32 = arith.constant 3.906250e-03 : f32
    %82 = vector.broadcast %cst_32 : f32 to vector<8x1xf32>
    %83 = arith.mulf %81, %82 : vector<8x1xf32>
    %84 = arith.mulf %79, %79 : vector<8x256xf32>
    %cst_33 = arith.constant dense<0.000000e+00> : vector<8xf32>
    %85 = vector.multi_reduction <add>, %84, %cst_33 [1] : vector<8x256xf32> to vector<8xf32>
    %86 = vector.shape_cast %85 : vector<8xf32> to vector<8x1xf32>
    %cst_34 = arith.constant 3.906250e-03 : f32
    %87 = vector.broadcast %cst_34 : f32 to vector<8x1xf32>
    %88 = arith.mulf %86, %87 : vector<8x1xf32>
    %89 = arith.mulf %83, %83 : vector<8x1xf32>
    %90 = arith.subf %88, %89 : vector<8x1xf32>
    %cst_35 = arith.constant 0.000000e+00 : f32
    %91 = vector.broadcast %cst_35 : f32 to vector<8x1xf32>
    %92 = arith.maximumf %90, %91 : vector<8x1xf32>
    %93 = vector.broadcast %83 : vector<8x1xf32> to vector<8x256xf32>
    %94 = arith.subf %79, %93 : vector<8x256xf32>
    %cst_36 = arith.constant 9.99999974E-6 : f32
    %95 = vector.broadcast %cst_36 : f32 to vector<8x1xf32>
    %96 = arith.addf %92, %95 : vector<8x1xf32>
    %97 = math.rsqrt %96 : vector<8x1xf32>
    %98 = vector.broadcast %97 : vector<8x1xf32> to vector<8x256xf32>
    %99 = arith.mulf %94, %98 : vector<8x256xf32>
    %cst_37 = arith.constant 0.000000e+00 : f32
    %100 = vector.broadcast %cst_37 : f32 to vector<8x256xf32>
    %101 = arith.maximumf %99, %100 : vector<8x256xf32>
    %c0_38 = arith.constant 0 : index
    %c0_39 = arith.constant 0 : index
    %102 = vector.load %arg3[%c0_38, %c0_39] : memref<16x8xf32, #tpu.memory_space<vmem>>, vector<16x8xf32>
    %cst_40 = arith.constant dense<0.000000e+00> : vector<16x256xf32>
    %103 = tpu.matmul %102, %101, %cst_40 {dimension_numbers = #tpu.dot_dimension_numbers<[1], [0], [0], [1], [0, 0, 1, 1], [], []>} : vector<16x8xf32>, vector<8x256xf32>, vector<16x256xf32> -> vector<16x256xf32>
    %cst_41 = arith.constant dense<0.000000e+00> : vector<16xf32>
    %104 = vector.multi_reduction <add>, %103, %cst_41 [1] : vector<16x256xf32> to vector<16xf32>
    %105 = vector.shape_cast %104 : vector<16xf32> to vector<16x1xf32>
    %cst_42 = arith.constant 3.906250e-03 : f32
    %106 = vector.broadcast %cst_42 : f32 to vector<16x1xf32>
    %107 = arith.mulf %105, %106 : vector<16x1xf32>
    %108 = arith.mulf %103, %103 : vector<16x256xf32>
    %cst_43 = arith.constant dense<0.000000e+00> : vector<16xf32>
    %109 = vector.multi_reduction <add>, %108, %cst_43 [1] : vector<16x256xf32> to vector<16xf32>
    %110 = vector.shape_cast %109 : vector<16xf32> to vector<16x1xf32>
    %cst_44 = arith.constant 3.906250e-03 : f32
    %111 = vector.broadcast %cst_44 : f32 to vector<16x1xf32>
    %112 = arith.mulf %110, %111 : vector<16x1xf32>
    %113 = arith.mulf %107, %107 : vector<16x1xf32>
    %114 = arith.subf %112, %113 : vector<16x1xf32>
    %cst_45 = arith.constant 0.000000e+00 : f32
    %115 = vector.broadcast %cst_45 : f32 to vector<16x1xf32>
    %116 = arith.maximumf %114, %115 : vector<16x1xf32>
    %117 = vector.broadcast %107 : vector<16x1xf32> to vector<16x256xf32>
    %118 = arith.subf %103, %117 : vector<16x256xf32>
    %cst_46 = arith.constant 9.99999974E-6 : f32
    %119 = vector.broadcast %cst_46 : f32 to vector<16x1xf32>
    %120 = arith.addf %116, %119 : vector<16x1xf32>
    %121 = math.rsqrt %120 : vector<16x1xf32>
    %122 = vector.broadcast %121 : vector<16x1xf32> to vector<16x256xf32>
    %123 = arith.mulf %118, %122 : vector<16x256xf32>
    %cst_47 = arith.constant 0.000000e+00 : f32
    %124 = vector.broadcast %cst_47 : f32 to vector<16x256xf32>
    %125 = arith.maximumf %123, %124 : vector<16x256xf32>
    %c0_48 = arith.constant 0 : index
    %c0_49 = arith.constant 0 : index
    %126 = vector.load %arg4[%c0_48, %c0_49] : memref<16x256xf32, #tpu.memory_space<vmem>>, vector<16x256xf32>
    tpu.vector_store %arg4[%c0_48, %c0_49], %125 {strides = array<i32>} : memref<16x256xf32, #tpu.memory_space<vmem>>, vector<16x256xf32>,
    return
  }
  func.func @transform_0(%arg0: i32) -> (i32, i32) {
    %c0_i32 = arith.constant 0 : i32
    %c0_i32_0 = arith.constant 0 : i32
    return %arg0, %c0_i32 : i32, i32
  }
  func.func @transform_1(%arg0: i32) -> (i32, i32, i32) {
    %c0_i32 = arith.constant 0 : i32
    %c0_i32_0 = arith.constant 0 : i32
    %c0_i32_1 = arith.constant 0 : i32
    %c0_i32_2 = arith.constant 0 : i32
    return %c0_i32, %c0_i32_0, %c0_i32_1 : i32, i32, i32
  }
  func.func @transform_2(%arg0: i32) -> (i32, i32) {
    %c0_i32 = arith.constant 0 : i32
    %c0_i32_0 = arith.constant 0 : i32
    %c0_i32_1 = arith.constant 0 : i32
    return %c0_i32, %c0_i32_0 : i32, i32
  }
  func.func @transform_3(%arg0: i32) -> (i32, i32) {
    %c0_i32 = arith.constant 0 : i32
    %c0_i32_0 = arith.constant 0 : i32
    return %arg0, %c0_i32 : i32, i32
  }
}

</mosaic_0001>

<bundles_post_ra>
// kernel: tpu_custom_call.1
= control target key start
LH: loop header
LB: loop body
LE: loop exit
PB: predicated region body
PF: predicated region fallthrough
CT: control target
= control target key end

     0   :  { %v389_v2 = vmov 0   ;;  %s390_s16 = smov 1   ;;  %v391_v5 = vmov 0.0   ;;  %s497_s0 = inlined_call_operand.vmem [shape: f32[8,256], index: 0, kind: input, shape index: {}]   ;;  %s498_s1 = inlined_call_operand.vmem [shape: f32[9,8,1], index: 1, kind: input, shape index: {}]   ;;  %s499_s2 = inlined_call_operand.vmem [shape: f32[16,8], index: 2, kind: input, shape index: {}]   ;;  %s500_s3 = inlined_call_operand.hbm [shape: f32[16,256], index: 3, kind: output, shape index: {}]  }
   0x1   :  { %v420_v0 = vld [vmem:[%s497_s0] sm:$0xff]  ;;  %359 = vset.pattern.permute.xlu0 %v389_v2  ;;  %v429_v3 = vld [vmem:[%s497_s0 + $0x8] sm:$0xff]  ;;  %360 = vset.pattern.permute.xlu1 %v389_v2 }
   0x2   :  { %v56_v1 = vld [vmem:[%s498_s1] sm:$0xff]  ;;  %38 = vrot.lane.b32.xlu1 %v420_v0, %s390_s16  ;;  %v339_v4 = vld [vmem:[%s498_s1 + $0x8] sm:$0xff]  ;;  %264 = vmatprep.mubr.f32.mxu0 %v391_v5 }
   0x3   :  { %59 = vperm.xlu0 %359, %v56_v1   ;;  %270 = vmatprep.mubr.f32.mxu1 %v391_v5 }
   0x4   :  { %8 = vsyncpa [#allocation3], 0  ;;  %v344_v6 = vld [vmem:[%s498_s1 + $0x30] sm:$0xff]  ;;  %v345_v8 = vld [vmem:[%s498_s1 + $0x38] sm:$0xff]  ;;  %s392_s26 = smov 127   ;;  %v17_v13 = vlaneseq  ;;  %s394_s8 = smov 112  }
   0x5   :  { %v340_v7 = vld [vmem:[%s498_s1 + $0x10] sm:$0xff]  ;;  %v346_v9 = vld [vmem:[%s498_s1 + $0x40] sm:$0xff]  ;;  %v341_v11 = vld [vmem:[%s498_s1 + $0x18] sm:$0xff]  ;;  %vm193_vm10 = vcmask 64512  }
   0x6   :  { %40 = vrot.lane.b32.xlu1 %v429_v3, %s390_s16  ;;  %v342_v10 = vld [vmem:[%s498_s1 + $0x20] sm:$0xff]  ;;  %v343_v12 = vld [vmem:[%s498_s1 + $0x28] sm:$0xff]  ;;  %v460_v15 = vand.u32 127, %v17_v13  ;;  %s393_s1 = smov 16  }
   0x7   :  { %68 = vperm.xlu0 %359, %v339_v4  }
   0x8   :  { %v463_v17 = vadd.s32 128, %v460_v15  ;;  %v20_v20 = vand.u32 15, %v460_v15  ;;  %vm42_vm2 = vcmp.lt.s32.totalorder %v460_v15, 1  ;;  %vm51_vm5 = vcmp.lt.s32.totalorder %v460_v15, 127 }
   0x9   :  { %vm30_vm6 = vcmp.ge.s32.totalorder %v460_v15, 16  ;;  %vm152_vm7 = vcmp.lt.s32.totalorder %v460_v15, 16  ;;  %vm163_vm9 = vcmp.lt.s32.totalorder %v460_v15, 112 }
   0xa   :  { %121 = vperm.xlu1 %360, %v344_v6   ;;  %v21_v21 = vand.u32 15, %v463_v17  ;;  %vm22_vm0 = vcmp.ge.s32.totalorder %v20_v20, 1  ;;  %vm26_vm3 = vcmp.lt.s32.totalorder %v20_v20, 15  ;;  %vm35_vm8 = vcmp.lt.s32.totalorder %v463_v17, 240 }
   0xb   :  { %79 = vperm.xlu0 %359, %v340_v7   ;;  %v24_v25 = vsel %vm22_vm0, 1.0, %v391_v5  ;;  %v28_v30 = vsel %vm26_vm3, 1.0, %v391_v5 }
   0xc   :  { %vm23_vm1 = vcmp.ge.s32.totalorder %v21_v21, 1  ;;  %vm27_vm4 = vcmp.lt.s32.totalorder %v21_v21, 15 }
   0xd   :  { %v25_v26 = vsel %vm23_vm1, 1.0, %v391_v5  ;;  %v29_v31 = vsel %vm27_vm4, 1.0, %v391_v5 }
   0xe   :  { %47 = vrot.lane.b32.xlu1 %v420_v0, %s392_s26 }
   0xf   :  { %130 = vperm.xlu0 %359, %v345_v8  }
  0x12   :  { %141 = vperm.xlu1 %360, %v346_v9  }
  0x13   :  { %49 = vrot.lane.b32.xlu0 %v429_v3, %s392_s26 }
  0x16   :  { %99 = vperm.xlu1 %360, %v342_v10   ;;  %v32_v10 = vsel %vm30_vm6, 1.0, %v391_v5 }
  0x17   :  { %90 = vperm.xlu0 %359, %v341_v11  }
  0x1b   :  { %110 = vperm.xlu0 %359, %v343_v12  }
  0x74   :  { %v39_v14 = vpop.permute.xlu1 %38 }
  0x78   :  { %v41_v18 = vpop.permute.xlu1 %40 }
  0x79   :  { %v43_v27 = vsel %vm42_vm2, %v39_v14, %v41_v18  ;;  %v44_v28 = vsel %vm42_vm2, %v41_v18, %v39_v14  ;;  %v37_v18 = vsel %vm35_vm8, 1.0, %v391_v5 }
  0x7a   :  { %v45_v32 = vmul.f32 %v44_v28, %v24_v25  ;;  %v46_v33 = vmul.f32 %v43_v27, %v25_v26 }
  0x7e   :  { %v60_v16 = vpop.permute.xlu0 %59 }
  0x7f   :  { %v62_v38 = vmul.f32 %v60_v16, %v45_v32  ;;  %v63_v39 = vmul.f32 %v60_v16, %v46_v33 }
  0x82   :  { %v69_v19 = vpop.permute.xlu0 %68 }
  0x83   :  { %v71_v34 = vmul.f32 %v69_v19, %v420_v0  ;;  %v72_v35 = vmul.f32 %v69_v19, %v429_v3 }
  0x85   :  { %v122_v22 = vpop.permute.xlu1 %121  ;;  %v73_v44 = vadd.f32 %v71_v34, %v62_v38  ;;  %v74_v45 = vadd.f32 %v72_v35, %v63_v39 }
  0x86   :  { %v80_v23 = vpop.permute.xlu0 %79  ;;  %v124_v46 = vmul.f32 %v122_v22, %v45_v32  ;;  %v125_v47 = vmul.f32 %v122_v22, %v46_v33 }
  0x89   :  { %v48_v24 = vpop.permute.xlu1 %47 }
  0x8a   :  { %v131_v29 = vpop.permute.xlu0 %130 }
  0x8b   :  { %v133_v49 = vmul.f32 %v131_v29, %v420_v0  ;;  %v134_v50 = vmul.f32 %v131_v29, %v429_v3 }
  0x8d   :  { %v142_v36 = vpop.permute.xlu1 %141  ;;  %v135_v62 = vadd.f32 %v133_v49, %v124_v46  ;;  %v136_v63 = vadd.f32 %v134_v50, %v125_v47 }
  0x8e   :  { %v50_v37 = vpop.permute.xlu0 %49 }
  0x8f   :  { %v52_v40 = vsel %vm51_vm5, %v48_v24, %v50_v37  ;;  %v53_v41 = vsel %vm51_vm5, %v50_v37, %v48_v24 }
  0x90   :  { %v54_v42 = vmul.f32 %v52_v40, %v28_v30  ;;  %v55_v43 = vmul.f32 %v53_v41, %v29_v31 }
  0x91   :  { %v100_v48 = vpop.permute.xlu1 %99 }
  0x92   :  { %v91_v51 = vpop.permute.xlu0 %90  ;;  %v83_v52 = vmul.f32 %v80_v23, %v55_v43  ;;  %v82_v53 = vmul.f32 %v80_v23, %v54_v42  ;;  %v102_v54 = vmul.f32 %v100_v48, %v420_v0  ;;  %v103_v55 = vmul.f32 %v100_v48, %v429_v3 }
  0x93   :  { %v93_v56 = vmul.f32 %v91_v51, %v45_v32  ;;  %v94_v57 = vmul.f32 %v91_v51, %v46_v33  ;;  %v145_v60 = vmul.f32 %v142_v36, %v55_v43  ;;  %v144_v61 = vmul.f32 %v142_v36, %v54_v42 }
  0x94   :  { %v85_v58 = vadd.f32 %v83_v52, %v74_v45  ;;  %v84_v59 = vadd.f32 %v82_v53, %v73_v44  ;;  %v191_v44 = vld [vmem:[%s499_s2] sm:$0xff]  ;;  %v192_v45 = vld [vmem:[%s499_s2 + $0x8] sm:$0xff]  ;;  %s395_s2 = smov [#allocation2]  }
  0x95   :  { %v104_v2 = vadd.f32 %v102_v54, %v93_v56  ;;  %v105_v4 = vadd.f32 %v103_v55, %v94_v57  ;;  %v147_v7 = vadd.f32 %v145_v60, %v136_v63  ;;  %v146_v3 = vadd.f32 %v144_v61, %v135_v62  ;;  %s328_s13 = sshll.u32 %s395_s2, 4  ;;  %s329_s13 = int_to_ptr.vmem [resolvable:$true] %s328_s13 }
  0x96   :  { %v111_v1 = vpop.permute.xlu0 %110  ;;  %150 = vrot.lane.b32.xlu0 %v85_v58, %s393_s1  ;;  %148 = vrot.lane.b32.xlu1 %v84_v59, %s393_s1  ;;  %s367_s14 = scalar_lea.vmem %s329_s13, 512  ;;  %p372_p1 = scmp.lt.s32.totalorder %s329_s13, %s329_s13 }
  0x97   :  { %v113_v6 = vmul.f32 %v111_v1, %v54_v42  ;;  %v114_v0 = vmul.f32 %v111_v1, %v55_v43  ;;  %p368_p0 = scmp.ne.s32.totalorder %s329_s13, %s367_s14  ;;  %p373_p2 = scmp.lt.s32.totalorder %s367_s14, %s367_s14 }
  0x99   :  { %v115_v8 = vadd.f32 %v113_v6, %v104_v2  ;;  %v116_v9 = vadd.f32 %v114_v0, %v105_v4  ;;  %p374_p3 = por %p373_p2, %p372_p1 }
  0x9a   :  { %161 = vrot.lane.b32.xlu0 %v147_v7, %s394_s8  ;;  %159 = vrot.lane.b32.xlu1 %v146_v3, %s394_s8 }
  0x9b   :  { %p375_p4 = pnand %p374_p3, %p368_p0 }
 0x108   :  { %v151_v11 = vpop.permute.xlu0 %150  ;;  %v149_v12 = vpop.permute.xlu1 %148 }
 0x109   :  { %v154_v13 = vsel %vm152_vm7, %v151_v11, %v149_v12  ;;  %v153_v16 = vsel %vm152_vm7, %v149_v12, %v151_v11 }
 0x10a   :  { %v155_v14 = vmul.f32 %v154_v13, %v32_v10  ;;  %v158_v24 = vadd.f32 %v153_v16, %v116_v9 }
 0x10c   :  { %v162_v19 = vpop.permute.xlu0 %161  ;;  %v157_v20 = vadd.f32 %v155_v14, %v115_v8  ;;  %v160_v21 = vpop.permute.xlu1 %159 }
 0x10d   :  { %v164_v22 = vsel %vm163_vm9, %v160_v21, %v162_v19  ;;  %v165_v23 = vsel %vm163_vm9, %v162_v19, %v160_v21 }
 0x10e   :  { %v167_v25 = vmul.f32 %v165_v23, %v37_v18  ;;  %v168_v26 = vadd.f32 %v164_v22, %v157_v20 }
 0x110   :  { %v169_v27 = vadd.f32 %v167_v25, %v158_v24  ;;  %v174_v29 = vmul.f32 %v168_v26, %v168_v26 }
 0x112   :  { %v170_v28 = vadd.f32 %v169_v27, %v168_v26  ;;  %v175_v30 = vmul.f32 %v169_v27, %v169_v27 }
 0x114   :  { %171 = vadd.xlane.f32.xlu1 %v170_v28  ;;  %v176_v17 = vadd.f32 %v175_v30, %v174_v29 }
 0x116   :  { %177 = vadd.xlane.f32.xlu0 %v176_v17 }
 0x19d   :  { %v172_v31 = vpop.xlane.xlu1 %171 }
 0x19e   :  { %v173_v15 = vmul.f32 0.00390625, %v172_v31 }
 0x19f   :  { %v178_v32 = vpop.xlane.xlu0 %177 }
 0x1a0   :  { %v179_v33 = vmul.f32 0.00390625, %v178_v32  ;;  %v180_v5 = vmul.f32 %v173_v15, %v173_v15  ;;  %v184_v37 = vsub.f32 %v169_v27, %v173_v15  ;;  %v183_v38 = vsub.f32 %v168_v26, %v173_v15 }
 0x1a2   :  { %v181_v34 = vsub.f32 %v179_v33, %v180_v5 }
 0x1a4   :  { %v182_v35 = vmax.f32 %v181_v34, 0.0 }
 0x1a6   :  { %v185_v36 = vadd.f32 1e-05, %v182_v35 }
 0x1a8   :  { %361 = vrsqrt.f32 %v185_v36 }
 0x1b5   :  { %v362_v39 = vpop.eup %361 }
 0x1b6   :  { %v188_v40 = vmul.f32 %v362_v39, %v184_v37  ;;  %v187_v41 = vmul.f32 %v362_v39, %v183_v38 }
 0x1b8   :  { %v190_v42 = vmax.f32 %v188_v40, 0.0  ;;  %v189_v43 = vmax.f32 %v187_v41, 0.0 }
 0x1ba   :  { %230 = vmatprep.subr.mxu0 %v190_v42  ;;  %349 = vmatprep.subr.mxu1 %v190_v42 }
 0x1bb   :  { %231 = vmatpush1.msra.mxu0 %v189_v43  ;;  %350 = vmatpush1.msra.mxu1 %v189_v43 }
 0x1bc   :  { %347 = vmatmul.mubr.msk.f32.vlgmr.msra.gmra.mxu0 %vm193_vm10, %v191_v44  ;;  %348 = vmatmul.mubr.msk.f32.vlgmr.msra.gmra.mxu1 %vm193_vm10, %v192_v45 }
 0x27c   :  { %v266_v46 = vpop.f32.mrf.mxu0  ;;  %v272_v47 = vpop.f32.mrf.mxu1 }
 0x27d   :  { %v287_v54 = vmul.f32 %v272_v47, %v272_v47  ;;  %v285_v55 = vmul.f32 %v266_v46, %v266_v46 }
 0x27e   :  { %v268_v48 = vpop.f32.mrf.mxu0  ;;  %v274_v49 = vpop.f32.mrf.mxu1 }
 0x27f   :  { %v286_v50 = vmul.f32 %v268_v48, %v268_v48  ;;  %v288_v51 = vmul.f32 %v274_v49, %v274_v49  ;;  %v280_v52 = vadd.f32 %v274_v49, %v272_v47  ;;  %v277_v53 = vadd.f32 %v268_v48, %v266_v46 }
 0x281   :  { %281 = vadd.xlane.f32.xlu1 %v280_v52  ;;  %278 = vadd.xlane.f32.xlu0 %v277_v53  ;;  %v292_v56 = vadd.f32 %v288_v51, %v287_v54  ;;  %v289_v57 = vadd.f32 %v286_v50, %v285_v55 }
 0x285   :  { %293 = vadd.xlane.f32.xlu1 %v292_v56  ;;  %290 = vadd.xlane.f32.xlu0 %v289_v57 }
 0x30a   :  { %v282_v58 = vpop.xlane.xlu1 %281  ;;  %v279_v59 = vpop.xlane.xlu0 %278 }
 0x30b   :  { %v284_v60 = vmul.f32 0.00390625, %v282_v58  ;;  %v283_v61 = vmul.f32 0.00390625, %v279_v59 }
 0x30d   :  { %v298_v1 = vmul.f32 %v284_v60, %v284_v60  ;;  %v297_v4 = vmul.f32 %v283_v61, %v283_v61  ;;  %v305_v11 = vsub.f32 %v272_v47, %v284_v60  ;;  %v306_v12 = vsub.f32 %v274_v49, %v284_v60 }
 0x30e   :  { %v294_v62 = vpop.xlane.xlu1 %293  ;;  %v291_v63 = vpop.xlane.xlu0 %290  ;;  %v303_v14 = vsub.f32 %v266_v46, %v283_v61  ;;  %v304_v16 = vsub.f32 %v268_v48, %v283_v61 }
 0x30f   :  { %v296_v2 = vmul.f32 0.00390625, %v294_v62  ;;  %v295_v6 = vmul.f32 0.00390625, %v291_v63 }
 0x311   :  { %v300_v0 = vsub.f32 %v296_v2, %v298_v1  ;;  %v299_v7 = vsub.f32 %v295_v6, %v297_v4 }
 0x313   :  { %v302_v3 = vmax.f32 %v300_v0, 0.0  ;;  %v301_v8 = vmax.f32 %v299_v7, 0.0 }
 0x315   :  { %v308_v9 = vadd.f32 1e-05, %v302_v3  ;;  %v307_v10 = vadd.f32 1e-05, %v301_v8 }
 0x317   :  { %363 = vrsqrt.f32 %v308_v9 }
 0x318   :  { %365 = vrsqrt.f32 %v307_v10 }
 0x324   :  { %v364_v13 = vpop.eup %363 }
 0x325   :  { %v366_v18 = vpop.eup %365  ;;  %v313_v19 = vmul.f32 %v364_v13, %v305_v11  ;;  %v314_v20 = vmul.f32 %v364_v13, %v306_v12 }
 0x326   :  { %v311_v21 = vmul.f32 %v366_v18, %v303_v14  ;;  %v312_v22 = vmul.f32 %v366_v18, %v304_v16 }
 0x327   :  { %v317_v23 = vmax.f32 %v313_v19, 0.0  ;;  %v318_v24 = vmax.f32 %v314_v20, 0.0 }
 0x328   :  { %v315_v25 = vmax.f32 %v311_v21, 0.0  ;;  %v316_v26 = vmax.f32 %v312_v22, 0.0 }
 0x329   :  { %321 = vst [vmem:[#allocation2 + $0x10] sm:$0xff] %v317_v23  ;;  %322 = vst [vmem:[#allocation2 + $0x18] sm:$0xff] %v318_v24 }
 0x32a   :  { %319 = vst [vmem:[#allocation2] sm:$0xff] %v315_v25  ;;  %320 = vst [vmem:[#allocation2 + $0x8] sm:$0xff] %v316_v26 }
 0x32b   :  { %378 = shalt.err (!%p375_p4)
}
 0x32c   :  { %s396_s15 = smov 256  }
 0x32d   :  { %334 = dma.vmem_to_hbm [thread:$0]  %s329_s13, 512, %s500_s3, [#allocation3], %s396_s15, %s396_s15, %s393_s1  }
 0x32e   :  { %387 = dma.done.wait [#allocation3], 512  }
 0x32f   :  { %388 = vsyncadd [#allocation3], 4294966784 }
 0x330   :  { %338 = vsyncpa [#allocation3], 1 }

</bundles_post_ra>
